<compile_context>
chip_gen: v7x
topology: tpu7x:2x2x1
jax: 0.10.0
libtpu: 0.0.40
codegen_flags: <defaults>
</compile_context>

<pallas_src>
import functools
import math

import jax
import jax.numpy as jnp
from jax import lax
from jax.experimental import pallas as pl
from jax.experimental.pallas import tpu as pltpu

_LANES = 128
_SUBLANES = 8
_MAX_BLOCK_ROWS = 1024   # (1024, 128) f32 tile = 512 KiB per input stream


def _diff_loss_kernel(img_ref, noshad_ref, label_ref, mask_ref,
                      out_ref, acc_ref, *,
                      valid_rows, block_rows, n_inner, needs_mask):
    i = pl.program_id(0)          # outer ("parallel") chunk
    j = pl.program_id(1)          # inner reduction step

    @pl.when(j == 0)
    def _():
        acc_ref[...] = jnp.zeros_like(acc_ref)

    img = img_ref[...].astype(jnp.float32)
    noshad = noshad_ref[...].astype(jnp.float32)
    label = label_ref[...].astype(jnp.float32)
    mask = mask_ref[...].astype(jnp.float32)

    keep = jnp.where(mask > 0.5, 0.0, 1.0)            # 1 - (mask > 0.5)
    diff = jnp.abs(img * keep - noshad * (1.0 - label))

    if needs_mask:
        # Ragged tail block: rows >= valid_rows hold unspecified data.
        row0 = (i * n_inner + j) * block_rows
        row_ids = row0 + lax.broadcasted_iota(jnp.int32, diff.shape, 0)
        diff = jnp.where(row_ids < valid_rows, diff, 0.0)

    # Per-lane accumulation (stays on the VPU); the single cross-lane reduce
    # is deferred to the wrapper.
    acc_ref[...] += jnp.sum(diff, axis=0, keepdims=True)

    @pl.when(j == pl.num_programs(1) - 1)
    def _():
        out_ref[0] = acc_ref[...]


def diff_loss_2(img, noshad, label, mask):
    """mean(|img * (1 - (mask > 0.5)) - noshad * (1 - label)|) via Pallas."""
    shape = jnp.broadcast_shapes(img.shape, noshad.shape, label.shape, mask.shape)
    total = math.prod(shape)
    pad = (-total) % _LANES

    def as_lanes(x):
        x = jnp.broadcast_to(x, shape).reshape(-1)    # free for same-shape inputs
        if pad:
            # Fallback only when total % 128 != 0 (not hit for typical NCHW
            # shapes); padded zeros contribute 0 to the |.| sum.
            x = jnp.pad(x, (0, pad))
        return x.reshape(-1, _LANES)

    xs = [as_lanes(a) for a in (img, noshad, label, mask)]
    rows = xs[0].shape[0]

    block_rows = max(_SUBLANES,
                     min(_MAX_BLOCK_ROWS, (rows // _SUBLANES) * _SUBLANES))
    n_blocks = -(-rows // block_rows)
    # Split across two outer chunks when it divides evenly so the "parallel"
    # axis can be sharded over TensorCores (v7x megacore); no-op on 1-TC chips.
    n_outer = 2 if (n_blocks >= 2 and n_blocks % 2 == 0) else 1
    n_inner = n_blocks // n_outer
    needs_mask = (rows % block_rows) != 0

    kernel = functools.partial(
        _diff_loss_kernel,
        valid_rows=rows, block_rows=block_rows,
        n_inner=n_inner, needs_mask=needs_mask)

    in_spec = pl.BlockSpec((block_rows, _LANES),
                           lambda i, j: (i * n_inner + j, 0))

    partials = pl.pallas_call(
        kernel,
        out_shape=jax.ShapeDtypeStruct((n_outer, 1, _LANES), jnp.float32),
        grid_spec=pltpu.PrefetchScalarGridSpec(
            num_scalar_prefetch=0,
            grid=(n_outer, n_inner),
            in_specs=[in_spec] * 4,
            out_specs=pl.BlockSpec((1, 1, _LANES), lambda i, j: (i, 0, 0)),
            scratch_shapes=[pltpu.VMEM((1, _LANES), jnp.float32)],
        ),
        compiler_params=pltpu.CompilerParams(
            dimension_semantics=("parallel", "arbitrary")),
    )(*xs)

    loss = jnp.sum(partials) / jnp.float32(total)
    return loss.astype(img.dtype)


if __name__ == "__main__":
    key = jax.random.PRNGKey(0)
    k1, k2, k3, k4 = jax.random.split(key, 4)
    shape = (2, 4, 16, 16)

    img = jax.random.normal(k1, shape, dtype=jnp.float32)
    noshad = jax.random.normal(k2, shape, dtype=jnp.float32)
    label = jax.random.uniform(k3, shape, dtype=jnp.float32)
    mask = jax.random.uniform(k4, shape, dtype=jnp.float32)

    out = diff_loss_2(img, noshad, label, mask)
    jax.block_until_ready(out)

    # plain-JAX reference of DiffLoss_2.forward
    keep = jnp.where(mask > 0.5, 0.0, 1.0)
    ref = jnp.mean(jnp.abs(img * keep - noshad * (1.0 - label)))
    assert jnp.allclose(out, ref, rtol=2e-5, atol=1e-6), (out, ref)

    print("KERNEL_OK")
</pallas_src>

<mosaic_0001>
module attributes {stable_mosaic.version = 11 : i64} {
  func.func @_diff_loss_kernel(%arg0: i32, %arg1: i32, %arg2: memref<16x128xf32, #tpu.memory_space<vmem>>, %arg3: memref<16x128xf32, #tpu.memory_space<vmem>>, %arg4: memref<16x128xf32, #tpu.memory_space<vmem>>, %arg5: memref<16x128xf32, #tpu.memory_space<vmem>>, %arg6: memref<1x1x128xf32, #tpu.memory_space<vmem>>, %arg7: memref<1x128xf32, #tpu.memory_space<vmem>>) attributes {dimension_semantics = [#tpu.dimension_semantics<parallel>, #tpu.dimension_semantics<arbitrary>], iteration_bounds = array<i64: 1, 1>, scalar_prefetch = 0 : i64, scratch_operands = 1 : i64, tpu.core_type = #tpu.core_type<tc>, window_params = [{transform_indices = @transform_0, window_bounds = array<i64: 16, 128>}, {transform_indices = @transform_1, window_bounds = array<i64: 16, 128>}, {transform_indices = @transform_2, window_bounds = array<i64: 16, 128>}, {transform_indices = @transform_3, window_bounds = array<i64: 16, 128>}, {transform_indices = @transform_4, window_bounds = array<i64: 1, 1, 128>}]} {
    %c0_i32 = arith.constant 0 : i32
    %0 = arith.cmpi eq, %arg1, %c0_i32 : i32
    %1 = arith.extui %0 : i1 to i32
    %c0_i32_0 = arith.constant 0 : i32
    %2 = arith.cmpi ne, %1, %c0_i32_0 : i32
    scf.if %2 {
      %cst_18 = arith.constant 0.000000e+00 : f32
      %26 = vector.broadcast %cst_18 : f32 to vector<1x128xf32>
      %c0_19 = arith.constant 0 : index
      %c0_20 = arith.constant 0 : index
      %27 = vector.load %arg7[%c0_19, %c0_20] : memref<1x128xf32, #tpu.memory_space<vmem>>, vector<1x128xf32>
      tpu.vector_store %arg7[%c0_19, %c0_20], %26 {strides = array<i32>} : memref<1x128xf32, #tpu.memory_space<vmem>>, vector<1x128xf32>,
    } else {
    }
    %c0 = arith.constant 0 : index
    %c0_1 = arith.constant 0 : index
    %3 = vector.load %arg2[%c0, %c0_1] : memref<16x128xf32, #tpu.memory_space<vmem>>, vector<16x128xf32>
    %c0_2 = arith.constant 0 : index
    %c0_3 = arith.constant 0 : index
    %4 = vector.load %arg3[%c0_2, %c0_3] : memref<16x128xf32, #tpu.memory_space<vmem>>, vector<16x128xf32>
    %c0_4 = arith.constant 0 : index
    %c0_5 = arith.constant 0 : index
    %5 = vector.load %arg4[%c0_4, %c0_5] : memref<16x128xf32, #tpu.memory_space<vmem>>, vector<16x128xf32>
    %c0_6 = arith.constant 0 : index
    %c0_7 = arith.constant 0 : index
    %6 = vector.load %arg5[%c0_6, %c0_7] : memref<16x128xf32, #tpu.memory_space<vmem>>, vector<16x128xf32>
    %cst = arith.constant 5.000000e-01 : f32
    %7 = vector.broadcast %cst : f32 to vector<16x128xf32>
    %8 = arith.cmpf ogt, %6, %7 : vector<16x128xf32>
    %cst_8 = arith.constant 0.000000e+00 : f32
    %cst_9 = arith.constant 1.000000e+00 : f32
    %9 = vector.broadcast %cst_8 : f32 to vector<16x128xf32>
    %10 = vector.broadcast %cst_9 : f32 to vector<16x128xf32>
    %11 = arith.select %8, %9, %10 : vector<16x128xi1>, vector<16x128xf32>
    %12 = arith.mulf %3, %11 : vector<16x128xf32>
    %cst_10 = arith.constant 1.000000e+00 : f32
    %13 = vector.broadcast %cst_10 : f32 to vector<16x128xf32>
    %14 = arith.subf %13, %5 : vector<16x128xf32>
    %15 = arith.mulf %4, %14 : vector<16x128xf32>
    %16 = arith.subf %12, %15 : vector<16x128xf32>
    %17 = math.absf %16 : vector<16x128xf32>
    %c0_11 = arith.constant 0 : index
    %c0_12 = arith.constant 0 : index
    %18 = vector.load %arg7[%c0_11, %c0_12] : memref<1x128xf32, #tpu.memory_space<vmem>>, vector<1x128xf32>
    %cst_13 = arith.constant dense<0.000000e+00> : vector<128xf32>
    %19 = vector.multi_reduction <add>, %17, %cst_13 [0] : vector<16x128xf32> to vector<128xf32>
    %20 = vector.shape_cast %19 : vector<128xf32> to vector<1x128xf32>
    %21 = arith.addf %18, %20 : vector<1x128xf32>
    %c0_14 = arith.constant 0 : index
    %c0_15 = arith.constant 0 : index
    %22 = vector.load %arg7[%c0_14, %c0_15] : memref<1x128xf32, #tpu.memory_space<vmem>>, vector<1x128xf32>
    tpu.vector_store %arg7[%c0_14, %c0_15], %21 {strides = array<i32>} : memref<1x128xf32, #tpu.memory_space<vmem>>, vector<1x128xf32>,
    %c0_i32_16 = arith.constant 0 : i32
    %23 = arith.cmpi eq, %arg1, %c0_i32_16 : i32
    %24 = arith.extui %23 : i1 to i32
    %c0_i32_17 = arith.constant 0 : i32
    %25 = arith.cmpi ne, %24, %c0_i32_17 : i32
    scf.if %25 {
      %c0_18 = arith.constant 0 : index
      %c0_19 = arith.constant 0 : index
      %26 = vector.load %arg7[%c0_18, %c0_19] : memref<1x128xf32, #tpu.memory_space<vmem>>, vector<1x128xf32>
      %c0_20 = arith.constant 0 : index
      %c0_21 = arith.constant 0 : index
      %c0_22 = arith.constant 0 : index
      %27 = vector.load %arg6[%c0_20, %c0_21, %c0_22] : memref<1x1x128xf32, #tpu.memory_space<vmem>>, vector<1x1x128xf32>
      %28 = vector.shape_cast %27 : vector<1x1x128xf32> to vector<1x128xf32>
      %29 = vector.shape_cast %26 : vector<1x128xf32> to vector<1x1x128xf32>
      tpu.vector_store %arg6[%c0_20, %c0_21, %c0_22], %29 {strides = array<i32>} : memref<1x1x128xf32, #tpu.memory_space<vmem>>, vector<1x1x128xf32>,
    } else {
    }
    return
  }
  func.func @transform_0(%arg0: i32, %arg1: i32) -> (i32, i32) {
    %c1_i32 = arith.constant 1 : i32
    %0 = arith.muli %arg0, %c1_i32 : i32
    %1 = arith.addi %0, %arg1 : i32
    %c0_i32 = arith.constant 0 : i32
    %c0_i32_0 = arith.constant 0 : i32
    return %1, %c0_i32 : i32, i32
  }
  func.func @transform_1(%arg0: i32, %arg1: i32) -> (i32, i32) {
    %c1_i32 = arith.constant 1 : i32
    %0 = arith.muli %arg0, %c1_i32 : i32
    %1 = arith.addi %0, %arg1 : i32
    %c0_i32 = arith.constant 0 : i32
    %c0_i32_0 = arith.constant 0 : i32
    return %1, %c0_i32 : i32, i32
  }
  func.func @transform_2(%arg0: i32, %arg1: i32) -> (i32, i32) {
    %c1_i32 = arith.constant 1 : i32
    %0 = arith.muli %arg0, %c1_i32 : i32
    %1 = arith.addi %0, %arg1 : i32
    %c0_i32 = arith.constant 0 : i32
    %c0_i32_0 = arith.constant 0 : i32
    return %1, %c0_i32 : i32, i32
  }
  func.func @transform_3(%arg0: i32, %arg1: i32) -> (i32, i32) {
    %c1_i32 = arith.constant 1 : i32
    %0 = arith.muli %arg0, %c1_i32 : i32
    %1 = arith.addi %0, %arg1 : i32
    %c0_i32 = arith.constant 0 : i32
    %c0_i32_0 = arith.constant 0 : i32
    return %1, %c0_i32 : i32, i32
  }
  func.func @transform_4(%arg0: i32, %arg1: i32) -> (i32, i32, i32) {
    %c0_i32 = arith.constant 0 : i32
    %c0_i32_0 = arith.constant 0 : i32
    %c0_i32_1 = arith.constant 0 : i32
    return %arg0, %c0_i32, %c0_i32_0 : i32, i32, i32
  }
}

</mosaic_0001>

<bundles_post_ra>
// kernel: tpu_custom_call.1
= control target key start
LH: loop header
LB: loop body
LE: loop exit
PB: predicated region body
PF: predicated region fallthrough
CT: control target
= control target key end

     0   :  { %9 = vsyncpa [#allocation4], 0  ;;  %s403_s0 = inlined_call_operand.hbm [shape: f32[16,128], index: 0, kind: input, shape index: {}]   ;;  %s404_s1 = inlined_call_operand.hbm [shape: f32[16,128], index: 1, kind: input, shape index: {}]   ;;  %s405_s2 = inlined_call_operand.hbm [shape: f32[16,128], index: 2, kind: input, shape index: {}]   ;;  %s406_s3 = inlined_call_operand.hbm [shape: f32[16,128], index: 3, kind: input, shape index: {}]   ;;  %s407_s4 = inlined_call_operand.hbm [shape: f32[1,1,128], index: 4, kind: output, shape index: {}]  }
   0x1   :  { %10 = vsyncpa [#allocation7], 0 }
   0x2   :  { %11 = vsyncpa [#allocation10], 0 }
   0x3   :  { %12 = vsyncpa [#allocation5], 0  ;;  %s283_s15 = smov [#allocation6]   ;;  %s284_s17 = smov [#allocation3]  }
   0x4   :  { %s38_s16 = sshll.u32 %s283_s15, 4  ;;  %s22_s18 = sshll.u32 %s284_s17, 4  ;;  %s39_s16 = int_to_ptr.vmem [resolvable:$true] %s38_s16  ;;  %s317_s18 = int_to_ptr.vmem [resolvable:$true] %s22_s18 }
   0x5   :  { %s165_s21 = scalar_lea.hbm %s404_s1, 256 }
   0x6   :  { %p166_p0 = scmp.ne.s32.totalorder %s404_s1, %s165_s21  ;;  %p169_p1 = scmp.lt.u32.totalorder %s165_s21, %s404_s1 }
   0x8   :  { %p171_p2 = pnand %p169_p1, %p166_p0 }
   0xa   :  { %174 = shalt.err (!%p171_p2)
}
   0xb   :  { %s175_s26 = scalar_lea.vmem %s39_s16, 256  ;;  %p180_p4 = scmp.lt.s32.totalorder %s39_s16, %s39_s16 }
   0xc   :  { %p176_p3 = scmp.ne.s32.totalorder %s39_s16, %s175_s26  ;;  %p181_p5 = scmp.lt.s32.totalorder %s175_s26, %s175_s26 }
   0xe   :  { %p182_p6 = por %p181_p5, %p180_p4 }
  0x10   :  { %p183_p7 = pnand %p182_p6, %p176_p3 }
  0x12   :  { %186 = shalt.err (!%p183_p7)
}
  0x13   :  { %s285_s27 = smov 128   ;;  %s286_s28 = smov 8  }
  0x14   :  { %44 = dma.hbm_to_vmem [thread:$0]  %s404_s1, 256, %s39_s16, [#allocation7], %s285_s27, %s285_s27, %s286_s28  }
  0x15   :  { %s187_s7 = scalar_lea.hbm %s403_s0, 256 }
  0x16   :  { %p188_p8 = scmp.ne.s32.totalorder %s403_s0, %s187_s7  ;;  %p191_p9 = scmp.lt.u32.totalorder %s187_s7, %s403_s0 }
  0x18   :  { %p193_p10 = pnand %p191_p9, %p188_p8 }
  0x1a   :  { %196 = shalt.err (!%p193_p10)
}
  0x1b   :  { %s197_s12 = scalar_lea.vmem %s317_s18, 256  ;;  %p202_p12 = scmp.lt.s32.totalorder %s317_s18, %s317_s18 }
  0x1c   :  { %p198_p11 = scmp.ne.s32.totalorder %s317_s18, %s197_s12  ;;  %p203_p13 = scmp.lt.s32.totalorder %s197_s12, %s197_s12 }
  0x1e   :  { %p204_p0 = por %p203_p13, %p202_p12 }
  0x20   :  { %p205_p1 = pnand %p204_p0, %p198_p11 }
  0x22   :  { %208 = shalt.err (!%p205_p1)
}
  0x23   :  { %28 = dma.hbm_to_vmem [thread:$0]  %s403_s0, 256, %s317_s18, [#allocation4], %s285_s27, %s285_s27, %s286_s28  }
  0x24   :  { %s287_s14 = smov [#allocation8]   ;;  %s288_s16 = smov [#allocation9]  }
  0x25   :  { %s54_s15 = sshll.u32 %s287_s14, 4  ;;  %s70_s17 = sshll.u32 %s288_s16, 4  ;;  %s55_s15 = int_to_ptr.vmem [resolvable:$true] %s54_s15  ;;  %s354_s17 = int_to_ptr.vmem [resolvable:$true] %s70_s17 }
  0x26   :  { %s209_s21 = scalar_lea.hbm %s405_s2, 256 }
  0x27   :  { %p210_p2 = scmp.ne.s32.totalorder %s405_s2, %s209_s21  ;;  %p213_p3 = scmp.lt.u32.totalorder %s209_s21, %s405_s2 }
  0x29   :  { %p215_p4 = pnand %p213_p3, %p210_p2 }
  0x2b   :  { %218 = shalt.err (!%p215_p4)
}
  0x2c   :  { %s219_s0 = scalar_lea.vmem %s55_s15, 256  ;;  %p224_p6 = scmp.lt.s32.totalorder %s55_s15, %s55_s15 }
  0x2d   :  { %p220_p5 = scmp.ne.s32.totalorder %s55_s15, %s219_s0  ;;  %p225_p7 = scmp.lt.s32.totalorder %s219_s0, %s219_s0 }
  0x2f   :  { %p226_p8 = por %p225_p7, %p224_p6 }
  0x31   :  { %p227_p9 = pnand %p226_p8, %p220_p5 }
  0x33   :  { %230 = shalt.err (!%p227_p9)
}
  0x34   :  { %60 = dma.hbm_to_vmem [thread:$0]  %s405_s2, 256, %s55_s15, [#allocation7], %s285_s27, %s285_s27, %s286_s28  }
  0x35   :  { %s231_s5 = scalar_lea.hbm %s406_s3, 256 }
  0x36   :  { %p232_p10 = scmp.ne.s32.totalorder %s406_s3, %s231_s5  ;;  %p235_p11 = scmp.lt.u32.totalorder %s231_s5, %s406_s3 }
  0x38   :  { %p237_p12 = pnand %p235_p11, %p232_p10 }
  0x3a   :  { %240 = shalt.err (!%p237_p12)
}
  0x3b   :  { %s241_s10 = scalar_lea.vmem %s354_s17, 256  ;;  %p246_p0 = scmp.lt.s32.totalorder %s354_s17, %s354_s17 }
  0x3c   :  { %p242_p13 = scmp.ne.s32.totalorder %s354_s17, %s241_s10  ;;  %p247_p1 = scmp.lt.s32.totalorder %s241_s10, %s241_s10 }
  0x3e   :  { %p248_p2 = por %p247_p1, %p246_p0 }
  0x40   :  { %p249_p3 = pnand %p248_p2, %p242_p13 }
  0x42   :  { %252 = shalt.err (!%p249_p3)
}
  0x43   :  { %76 = dma.hbm_to_vmem [thread:$0]  %s406_s3, 256, %s354_s17, [#allocation10], %s285_s27, %s285_s27, %s286_s28  }
  0x44   :  { %275 = dma.done.wait [#allocation4], 256  }
  0x45   :  { %276 = vsyncadd [#allocation4], 4294967040 }
  0x46   :  { %277 = dma.done.wait [#allocation7], 512  }
  0x47   :  { %278 = vsyncadd [#allocation7], 4294966784 }
  0x48   :  { %279 = dma.done.wait [#allocation10], 256  }
  0x49   :  { %280 = vsyncadd [#allocation10], 4294967040  ;;  %v289_v0 = vmov 0.0   ;;  %v102_v1 = vld [vmem:[#allocation3] sm:$0xff]  ;;  %v104_v2 = vld [vmem:[#allocation6] sm:$0xff]  ;;  %v290_v11 = vmov 1.0  }
  0x4a   :  { %101 = vst [vmem:[#allocation2] sm:$0x1] %v289_v0  ;;  %v105_v3 = vld [vmem:[#allocation6 + $0x8] sm:$0xff]  ;;  %v106_v4 = vld [vmem:[#allocation8] sm:$0xff]  ;;  %v107_v5 = vld [vmem:[#allocation8 + $0x8] sm:$0xff]  ;;  %s291_s3 = smov [#allocation11]  }
  0x4b   :  { %v103_v6 = vld [vmem:[#allocation3 + $0x8] sm:$0xff]  ;;  %v108_v7 = vld [vmem:[#allocation9] sm:$0xff]  ;;  %v109_v8 = vld [vmem:[#allocation9 + $0x8] sm:$0xff]  ;;  %v116_v9 = vsub.f32 1.0, %v106_v4  ;;  %v117_v10 = vsub.f32 1.0, %v107_v5  ;;  %s145_s27 = sshll.u32 %s291_s3, 4  ;;  %s146_s27 = int_to_ptr.vmem [resolvable:$true] %s145_s27 }
  0x4c   :  { %vm110_vm0 = vcmp.gt.f32.partialorder %v108_v7, 0.5  ;;  %vm111_vm1 = vcmp.gt.f32.partialorder %v109_v8, 0.5  ;;  %s253_s28 = scalar_lea.vmem %s146_s27, 16  ;;  %s257_s12 = scalar_lea.vmem %s146_s27, 32 }
  0x4d   :  { %v112_v12 = vsel %vm110_vm0, 0.0, %v290_v11  ;;  %v113_v13 = vsel %vm111_vm1, 0.0, %v290_v11  ;;  %v118_v14 = vmul.f32 %v116_v9, %v104_v2  ;;  %v119_v15 = vmul.f32 %v117_v10, %v105_v3  ;;  %p254_p4 = scmp.ne.s32.totalorder %s146_s27, %s253_s28  ;;  %p258_p5 = scmp.lt.s32.totalorder %s146_s27, %s146_s27 }
  0x4e   :  { %v114_v16 = vmul.f32 %v112_v12, %v102_v1  ;;  %v115_v17 = vmul.f32 %v113_v13, %v103_v6  ;;  %p259_p6 = scmp.lt.s32.totalorder %s257_s12, %s253_s28 }
  0x50   :  { %v120_v18 = vsub.f32 %v114_v16, %v118_v14  ;;  %v121_v19 = vsub.f32 %v115_v17, %v119_v15  ;;  %p260_p7 = por %p259_p6, %p258_p5 }
  0x51   :  { %v124_v28 = vld [vmem:[#allocation2] sm:$0x1] }
  0x52   :  { %v122_v20 = vand.u32 2147483647, %v120_v18  ;;  %v123_v21 = vand.u32 2147483647, %v121_v19  ;;  %p261_p8 = pnand %p260_p7, %p254_p4 }
  0x54   :  { %v125_v22 = vadd.f32 %v123_v21, %v122_v20 }
  0x56   :  { %v126_v23 = vrot.slane %v125_v22, 4 }
  0x58   :  { %v127_v24 = vadd.f32 %v126_v23, %v125_v22 }
  0x5a   :  { %v128_v25 = vrot.slane %v127_v24, 2 }
  0x5c   :  { %v129_v26 = vadd.f32 %v128_v25, %v127_v24 }
  0x5e   :  { %v130_v27 = vrot.slane %v129_v26, 1 }
  0x60   :  { %v131_v29 = vadd.f32 %v130_v27, %v129_v26 }
  0x62   :  { %v132_v30 = vadd.f32 %v131_v29, %v124_v28 }
  0x64   :  { %133 = vst [vmem:[#allocation2] sm:$0x1] %v132_v30 }
  0x6b   :  { %v137_v31 = vld [vmem:[#allocation2] sm:$0x1] }
  0x6c   :  { %138 = vst [vmem:[#allocation11] sm:$0x1] %v137_v31 }
  0x6d   :  { %264 = shalt.err (!%p261_p8)
}
  0x6e   :  { %s265_s14 = scalar_lea.hbm %s407_s4, 16 }
  0x6f   :  { %p266_p9 = scmp.ne.s32.totalorder %s407_s4, %s265_s14  ;;  %p269_p10 = scmp.lt.u32.totalorder %s265_s14, %s407_s4 }
  0x71   :  { %p271_p11 = pnand %p269_p10, %p266_p9 }
  0x73   :  { %274 = shalt.err (!%p271_p11)
}
  0x74   :  { %148 = dma.vmem_to_hbm [thread:$0]  %s146_s27, 16, %s407_s4, [#allocation5]  }
  0x75   :  { %281 = dma.done.wait [#allocation5], 16  }
  0x76   :  { %282 = vsyncadd [#allocation5], 4294967280 }
  0x77   :  { %152 = vsyncpa [#allocation4], 1 }
  0x78   :  { %153 = vsyncpa [#allocation7], 1 }
  0x79   :  { %154 = vsyncpa [#allocation10], 1 }
  0x7a   :  { %155 = vsyncpa [#allocation5], 1 }

</bundles_post_ra>
